<compile_context>
chip_gen: v6e
topology: v6e:2x2x1
jax: 0.10.0
libtpu: 0.0.40
codegen_flags: <defaults>
</compile_context>

<pallas_src>
import functools

import jax
import jax.numpy as jnp
from jax import lax
from jax.experimental import pallas as pl
from jax.experimental.pallas import tpu as pltpu


def blaze_kernel(p_ref, w_ref, b_ref, out_ref, stk_ref, *, s, wrow, lt, cin, cout):
    """Fused BlazeBlock body for one (image, row-block) grid step.

    p_ref:   (1, 1, P, Cin, Fb) bf16   parity planes, flat spatial axis with
                                       row pitch `wrow` (P = s*s).
    w_ref:   (Cout, 9*Cin)      bf16   fused depthwise*pointwise weights
                                       (stride=1: residual identity folded in).
    b_ref:   (Cout, 1)          f32    fused bias (bd @ wp + bp).
    out_ref: (1, 1, Cout, Lt)   bf16   flat output tile (junk cols trimmed later).
    stk_ref: (9*Cin, Lt)        bf16   VMEM scratch holding the 9 stacked taps.
    """
    res = None
    for ky in range(3):
        for kx in range(3):
            by, oy = ky % s, ky // s
            bx, ox = kx % s, kx // s
            t = 3 * ky + kx
            # tap[c, p*wrow + q] == conv_input[c, s*p + ky, s*q + kx] (block-local)
            tap = p_ref[0, 0, s * by + bx, :, pl.ds(oy * wrow + ox, lt)]  # (Cin, Lt)
            stk_ref[t * cin:(t + 1) * cin, :] = tap
            if s == 2 and oy == 0 and ox == 0:
                # residual = 2x2 stride-2 maxpool = max of the 4 offset-0 taps,
                # which are exactly the parity planes -- no extra loads.
                res = tap if res is None else jnp.maximum(res, tap)

    # one K-fused MXU matmul: (Cout, 9*Cin) @ (9*Cin, Lt), f32 accumulate
    acc = jnp.dot(w_ref[...], stk_ref[...], preferred_element_type=jnp.float32)
    acc = acc + b_ref[...]                                        # bias (f32)

    if s == 1:
        # stride-1 residual is already folded into the centre-tap weights
        out_ref[0, 0] = jnp.clip(acc, 0.0, 6.0).astype(out_ref.dtype)
    else:
        # residual (maxpool) added to the first Cin channels; channels >= Cin
        # are the zero-padded part of the residual.
        lo = acc[:cin, :] + res.astype(jnp.float32)
        out_ref[0, 0, :cin, :] = jnp.clip(lo, 0.0, 6.0).astype(out_ref.dtype)
        if cout > cin:
            out_ref[0, 0, cin:, :] = jnp.clip(acc[cin:, :], 0.0, 6.0
                                              ).astype(out_ref.dtype)


def _rows_per_block(ho, wrow, cout, *, acc_budget_bytes=128 * 1024, max_rows=32):
    """Output rows per grid step so the f32 accumulator stays register-sized."""
    per_row = cout * wrow * 4
    return int(max(1, min(ho, max_rows, acc_budget_bytes // max(per_row, 1))))


def blaze_block(x_nchw, wd, bd, wp, bp, *, stride=1, rows_per_block=None):
    """BlazeBlock forward. x_nchw: (N, Cin, H, W) f32; returns (N, Cout, Ho, Wo) bf16."""
    N, Cin, H, W = x_nchw.shape
    Cout = wp.shape[1]
    assert Cout >= Cin
    s = stride
    assert s in (1, 2)

    if s == 1:
        Ho, Wo = H, W
        Wrow = W + 2                      # padded row pitch (conv padding = 1)
    else:
        Ho, Wo = H // 2, W // 2
        Wrow = Wo + 1                     # parity-plane row pitch
    halo = 2 // s                         # extra input rows per block (2 or 1)

    TR = rows_per_block or _rows_per_block(Ho, Wrow, Cout)
    R = pl.cdiv(Ho, TR)
    rows_total = R * TR
    Fb = (TR + halo) * Wrow + halo        # per-block flat input length (+ tap tail)
    Lt = TR * Wrow                        # per-block flat output length

    xb = x_nchw.astype(jnp.bfloat16)
    if s == 1:
        # pad=1 on all sides; extra bottom rows so row blocks divide evenly
        xp = jnp.pad(xb, ((0, 0), (0, 0), (1, 1 + rows_total - Ho), (1, 1)))
        planes = xp.reshape(N, 1, Cin, (rows_total + 2) * Wrow)   # P = 1
    else:
        Hq, Wq = rows_total + 1, Wrow
        xp = jnp.pad(xb, ((0, 0), (0, 0), (0, 2 * Hq - H), (0, 2 * Wq - W)))
        # parity planes via strided slices stacked on a new axis (no 6-D transpose)
        planes = jnp.stack([xp[:, :, by::2, bx::2]
                            for by in range(2) for bx in range(2)], axis=1)
        planes = planes.reshape(N, 4, Cin, Hq * Wq)               # P = 4
    P = planes.shape[1]
    planes = jnp.pad(planes, ((0, 0), (0, 0), (0, 0), (0, halo)))  # tap tail slack
    # pre-split row blocks (duplicating the `halo` rows between adjacent blocks)
    blocks = jnp.stack([planes[..., r * TR * Wrow: r * TR * Wrow + Fb]
                        for r in range(R)], axis=1)               # (N,R,P,Cin,Fb)

    # fused depthwise*pointwise weights: Wf[ky,kx,ci,co] = wd[ky,kx,ci]*wp[ci,co]
    wf = (wd[:, :, :, None].astype(jnp.float32) *
          wp[None, None, :, :].astype(jnp.float32))               # (3,3,Cin,Cout)
    if s == 1:
        # fold the (channel-zero-padded) identity residual into the centre tap
        wf = wf.at[1, 1].add(jnp.eye(Cin, Cout, dtype=jnp.float32))
    wflat = wf.transpose(3, 0, 1, 2).reshape(Cout, 9 * Cin).astype(jnp.bfloat16)
    bf = (bd.astype(jnp.float32) @ wp.astype(jnp.float32)
          + bp.astype(jnp.float32)).reshape(Cout, 1)

    kernel = functools.partial(blaze_kernel, s=s, wrow=Wrow, lt=Lt,
                               cin=Cin, cout=Cout)

    # explicit per-step VMEM budget: double-buffered I/O + stacked-tap scratch
    est = 2 * (P * Cin * Fb * 2 + Cout * Lt * 2 + Cout * 9 * Cin * 2 + Cout * 4) \
        + 9 * Cin * Lt * 2
    vmem_limit = int(min(64 << 20, max(16 << 20, 4 * est)))

    out = pl.pallas_call(
        kernel,
        out_shape=jax.ShapeDtypeStruct((N, R, Cout, Lt), jnp.bfloat16),
        grid=(N, R),
        in_specs=[
            pl.BlockSpec((1, 1, P, Cin, Fb), lambda n, r: (n, r, 0, 0, 0)),
            pl.BlockSpec((Cout, 9 * Cin), lambda n, r: (0, 0)),
            pl.BlockSpec((Cout, 1), lambda n, r: (0, 0)),
        ],
        out_specs=pl.BlockSpec((1, 1, Cout, Lt), lambda n, r: (n, r, 0, 0)),
        scratch_shapes=[pltpu.VMEM((9 * Cin, Lt), jnp.bfloat16)],
        compiler_params=pltpu.CompilerParams(
            dimension_semantics=("parallel", "parallel"),
            vmem_limit_bytes=vmem_limit),
    )(blocks, wflat, bf)

    # (N,R,Cout,TR,Wrow) -> NCHW; junk columns / padded rows are trimmed here.
    out = out.reshape(N, R, Cout, TR, Wrow).transpose(0, 2, 1, 3, 4)
    out = out.reshape(N, Cout, rows_total, Wrow)[:, :, :Ho, :Wo]
    return out


def blaze_block_ref(x, wd, bd, wp, bp, stride):
    """Pure-JAX f32 reference mirroring the PyTorch forward (NCHW)."""
    N, Cin, H, W = x.shape
    Cout = wp.shape[1]
    if stride == 2:
        conv_in = jnp.pad(x, ((0, 0), (0, 0), (0, 1), (0, 1)))
        pad = ((0, 0), (0, 0))
        xr = lax.reduce_window(x, -jnp.inf, lax.max,
                               (1, 1, 2, 2), (1, 1, 2, 2), 'VALID')
    else:
        conv_in = x
        pad = ((1, 1), (1, 1))
        xr = x
    dw_w = jnp.transpose(wd, (2, 0, 1))[:, None, :, :]            # (Cin,1,3,3)
    dw = lax.conv_general_dilated(conv_in, dw_w, (stride, stride), pad,
                                  feature_group_count=Cin,
                                  dimension_numbers=('NCHW', 'OIHW', 'NCHW'))
    dw = dw + bd[None, :, None, None]
    pw_w = jnp.transpose(wp)[:, :, None, None]                    # (Cout,Cin,1,1)
    pwc = lax.conv_general_dilated(dw, pw_w, (1, 1), ((0, 0), (0, 0)),
                                   dimension_numbers=('NCHW', 'OIHW', 'NCHW'))
    pwc = pwc + bp[None, :, None, None]
    if Cout > Cin:
        xr = jnp.pad(xr, ((0, 0), (0, Cout - Cin), (0, 0), (0, 0)))
    return jnp.clip(pwc + xr, 0.0, 6.0)


if __name__ == "__main__":
    key = jax.random.PRNGKey(0)
    N, Cin, H, W = 2, 4, 16, 16
    Cout = 8
    k1, k2, k3, k4, k5 = jax.random.split(key, 5)
    x = jax.random.normal(k1, (N, Cin, H, W), jnp.float32)
    # synthetic parameters (torch layouts: depthwise (Cin,1,3,3) -> here (3,3,Cin),
    # pointwise (Cout,Cin,1,1) -> here (Cin,Cout))
    wd = jax.random.normal(k2, (3, 3, Cin), jnp.float32) * 0.3
    bd = jax.random.normal(k3, (Cin,), jnp.float32) * 0.1
    wp = jax.random.normal(k4, (Cin, Cout), jnp.float32) * 0.3
    bp = jax.random.normal(k5, (Cout,), jnp.float32) * 0.1

    # (Cout, stride) configs: channel-pad + no-pad, stride 1 and 2
    for (co, stride) in ((Cout, 1), (Cout, 2), (Cin, 2)):
        wpc, bpc = wp[:, :co], bp[:co]
        out = blaze_block(x, wd, bd, wpc, bpc, stride=stride)
        out = jax.block_until_ready(out)
        ref = blaze_block_ref(x, wd, bd, wpc, bpc, stride)
        assert out.shape == ref.shape, (out.shape, ref.shape)
        err = float(jnp.max(jnp.abs(out.astype(jnp.float32) - ref)))
        # bf16 activations/weights on the MXU, bf16 residual folded into the
        # fused weight (stride=1) and a bf16 output stream: worst-case rounding
        # is a few * |out| * 2^-8 on a [0,6] output range -> gate at 6e-2.
        assert err < 6e-2, f"cout={co} stride={stride} max abs err {err}"
    print("KERNEL_OK")
</pallas_src>

<mosaic_0001>
module attributes {stable_mosaic.version = 11 : i64} {
  func.func @blaze_kernel(%arg0: i32, %arg1: i32, %arg2: memref<1x1x1x4x326xbf16, #tpu.memory_space<vmem>>, %arg3: memref<8x36xbf16, #tpu.memory_space<vmem>>, %arg4: memref<8x1xf32, #tpu.memory_space<vmem>>, %arg5: memref<1x1x8x288xbf16, #tpu.memory_space<vmem>>, %arg6: memref<36x288xbf16, #tpu.memory_space<vmem>>) attributes {dimension_semantics = [#tpu.dimension_semantics<parallel>, #tpu.dimension_semantics<parallel>], iteration_bounds = array<i64: 2, 1>, scalar_prefetch = 0 : i64, scratch_operands = 1 : i64, tpu.core_type = #tpu.core_type<tc>, window_params = [{transform_indices = @transform_0, window_bounds = array<i64: 1, 1, 1, 4, 326>}, {pipeline_mode = #tpu.pipeline_mode<synchronous>, transform_indices = @transform_1, window_bounds = array<i64: 8, 36>}, {pipeline_mode = #tpu.pipeline_mode<synchronous>, transform_indices = @transform_2, window_bounds = array<i64: 8, 1>}, {transform_indices = @transform_3, window_bounds = array<i64: 1, 1, 8, 288>}]} {
    %c0 = arith.constant 0 : index
    %c0_0 = arith.constant 0 : index
    %c0_1 = arith.constant 0 : index
    %c0_2 = arith.constant 0 : index
    %c0_3 = arith.constant 0 : index
    %0 = vector.load %arg2[%c0, %c0_0, %c0_1, %c0_2, %c0_3] : memref<1x1x1x4x326xbf16, #tpu.memory_space<vmem>>, vector<1x1x1x4x288xbf16>
    %1 = vector.shape_cast %0 : vector<1x1x1x4x288xbf16> to vector<4x288xbf16>
    %c0_4 = arith.constant 0 : index
    %c0_5 = arith.constant 0 : index
    %2 = vector.load %arg6[%c0_4, %c0_5] : memref<36x288xbf16, #tpu.memory_space<vmem>>, vector<4x288xbf16>
    tpu.vector_store %arg6[%c0_4, %c0_5], %1 {strides = array<i32>} : memref<36x288xbf16, #tpu.memory_space<vmem>>, vector<4x288xbf16>,
    %c0_6 = arith.constant 0 : index
    %c0_7 = arith.constant 0 : index
    %c0_8 = arith.constant 0 : index
    %c0_9 = arith.constant 0 : index
    %c1 = arith.constant 1 : index
    %3 = vector.load %arg2[%c0_6, %c0_7, %c0_8, %c0_9, %c1] : memref<1x1x1x4x326xbf16, #tpu.memory_space<vmem>>, vector<1x1x1x4x288xbf16>
    %4 = vector.shape_cast %3 : vector<1x1x1x4x288xbf16> to vector<4x288xbf16>
    %c4 = arith.constant 4 : index
    %c0_10 = arith.constant 0 : index
    %5 = vector.load %arg6[%c4, %c0_10] : memref<36x288xbf16, #tpu.memory_space<vmem>>, vector<4x288xbf16>
    tpu.vector_store %arg6[%c4, %c0_10], %4 {strides = array<i32>} : memref<36x288xbf16, #tpu.memory_space<vmem>>, vector<4x288xbf16>,
    %c0_11 = arith.constant 0 : index
    %c0_12 = arith.constant 0 : index
    %c0_13 = arith.constant 0 : index
    %c0_14 = arith.constant 0 : index
    %c2 = arith.constant 2 : index
    %6 = vector.load %arg2[%c0_11, %c0_12, %c0_13, %c0_14, %c2] : memref<1x1x1x4x326xbf16, #tpu.memory_space<vmem>>, vector<1x1x1x4x288xbf16>
    %7 = vector.shape_cast %6 : vector<1x1x1x4x288xbf16> to vector<4x288xbf16>
    %c8 = arith.constant 8 : index
    %c0_15 = arith.constant 0 : index
    %8 = vector.load %arg6[%c8, %c0_15] : memref<36x288xbf16, #tpu.memory_space<vmem>>, vector<4x288xbf16>
    tpu.vector_store %arg6[%c8, %c0_15], %7 {strides = array<i32>} : memref<36x288xbf16, #tpu.memory_space<vmem>>, vector<4x288xbf16>,
    %c0_16 = arith.constant 0 : index
    %c0_17 = arith.constant 0 : index
    %c0_18 = arith.constant 0 : index
    %c0_19 = arith.constant 0 : index
    %c18 = arith.constant 18 : index
    %9 = vector.load %arg2[%c0_16, %c0_17, %c0_18, %c0_19, %c18] : memref<1x1x1x4x326xbf16, #tpu.memory_space<vmem>>, vector<1x1x1x4x288xbf16>
    %10 = vector.shape_cast %9 : vector<1x1x1x4x288xbf16> to vector<4x288xbf16>
    %c12 = arith.constant 12 : index
    %c0_20 = arith.constant 0 : index
    %11 = vector.load %arg6[%c12, %c0_20] : memref<36x288xbf16, #tpu.memory_space<vmem>>, vector<4x288xbf16>
    tpu.vector_store %arg6[%c12, %c0_20], %10 {strides = array<i32>} : memref<36x288xbf16, #tpu.memory_space<vmem>>, vector<4x288xbf16>,
    %c0_21 = arith.constant 0 : index
    %c0_22 = arith.constant 0 : index
    %c0_23 = arith.constant 0 : index
    %c0_24 = arith.constant 0 : index
    %c19 = arith.constant 19 : index
    %12 = vector.load %arg2[%c0_21, %c0_22, %c0_23, %c0_24, %c19] : memref<1x1x1x4x326xbf16, #tpu.memory_space<vmem>>, vector<1x1x1x4x288xbf16>
    %13 = vector.shape_cast %12 : vector<1x1x1x4x288xbf16> to vector<4x288xbf16>
    %c16 = arith.constant 16 : index
    %c0_25 = arith.constant 0 : index
    %14 = vector.load %arg6[%c16, %c0_25] : memref<36x288xbf16, #tpu.memory_space<vmem>>, vector<4x288xbf16>
    tpu.vector_store %arg6[%c16, %c0_25], %13 {strides = array<i32>} : memref<36x288xbf16, #tpu.memory_space<vmem>>, vector<4x288xbf16>,
    %c0_26 = arith.constant 0 : index
    %c0_27 = arith.constant 0 : index
    %c0_28 = arith.constant 0 : index
    %c0_29 = arith.constant 0 : index
    %c20 = arith.constant 20 : index
    %15 = vector.load %arg2[%c0_26, %c0_27, %c0_28, %c0_29, %c20] : memref<1x1x1x4x326xbf16, #tpu.memory_space<vmem>>, vector<1x1x1x4x288xbf16>
    %16 = vector.shape_cast %15 : vector<1x1x1x4x288xbf16> to vector<4x288xbf16>
    %c20_30 = arith.constant 20 : index
    %c0_31 = arith.constant 0 : index
    %17 = vector.load %arg6[%c20_30, %c0_31] : memref<36x288xbf16, #tpu.memory_space<vmem>>, vector<4x288xbf16>
    tpu.vector_store %arg6[%c20_30, %c0_31], %16 {strides = array<i32>} : memref<36x288xbf16, #tpu.memory_space<vmem>>, vector<4x288xbf16>,
    %c0_32 = arith.constant 0 : index
    %c0_33 = arith.constant 0 : index
    %c0_34 = arith.constant 0 : index
    %c0_35 = arith.constant 0 : index
    %c36 = arith.constant 36 : index
    %18 = vector.load %arg2[%c0_32, %c0_33, %c0_34, %c0_35, %c36] : memref<1x1x1x4x326xbf16, #tpu.memory_space<vmem>>, vector<1x1x1x4x288xbf16>
    %19 = vector.shape_cast %18 : vector<1x1x1x4x288xbf16> to vector<4x288xbf16>
    %c24 = arith.constant 24 : index
    %c0_36 = arith.constant 0 : index
    %20 = vector.load %arg6[%c24, %c0_36] : memref<36x288xbf16, #tpu.memory_space<vmem>>, vector<4x288xbf16>
    tpu.vector_store %arg6[%c24, %c0_36], %19 {strides = array<i32>} : memref<36x288xbf16, #tpu.memory_space<vmem>>, vector<4x288xbf16>,
    %c0_37 = arith.constant 0 : index
    %c0_38 = arith.constant 0 : index
    %c0_39 = arith.constant 0 : index
    %c0_40 = arith.constant 0 : index
    %c37 = arith.constant 37 : index
    %21 = vector.load %arg2[%c0_37, %c0_38, %c0_39, %c0_40, %c37] : memref<1x1x1x4x326xbf16, #tpu.memory_space<vmem>>, vector<1x1x1x4x288xbf16>
    %22 = vector.shape_cast %21 : vector<1x1x1x4x288xbf16> to vector<4x288xbf16>
    %c28 = arith.constant 28 : index
    %c0_41 = arith.constant 0 : index
    %23 = vector.load %arg6[%c28, %c0_41] : memref<36x288xbf16, #tpu.memory_space<vmem>>, vector<4x288xbf16>
    tpu.vector_store %arg6[%c28, %c0_41], %22 {strides = array<i32>} : memref<36x288xbf16, #tpu.memory_space<vmem>>, vector<4x288xbf16>,
    %c0_42 = arith.constant 0 : index
    %c0_43 = arith.constant 0 : index
    %c0_44 = arith.constant 0 : index
    %c0_45 = arith.constant 0 : index
    %c38 = arith.constant 38 : index
    %24 = vector.load %arg2[%c0_42, %c0_43, %c0_44, %c0_45, %c38] : memref<1x1x1x4x326xbf16, #tpu.memory_space<vmem>>, vector<1x1x1x4x288xbf16>
    %25 = vector.shape_cast %24 : vector<1x1x1x4x288xbf16> to vector<4x288xbf16>
    %c32 = arith.constant 32 : index
    %c0_46 = arith.constant 0 : index
    %26 = vector.load %arg6[%c32, %c0_46] : memref<36x288xbf16, #tpu.memory_space<vmem>>, vector<4x288xbf16>
    tpu.vector_store %arg6[%c32, %c0_46], %25 {strides = array<i32>} : memref<36x288xbf16, #tpu.memory_space<vmem>>, vector<4x288xbf16>,
    %c0_47 = arith.constant 0 : index
    %c0_48 = arith.constant 0 : index
    %27 = vector.load %arg3[%c0_47, %c0_48] : memref<8x36xbf16, #tpu.memory_space<vmem>>, vector<8x36xbf16>
    %c0_49 = arith.constant 0 : index
    %c0_50 = arith.constant 0 : index
    %28 = vector.load %arg6[%c0_49, %c0_50] : memref<36x288xbf16, #tpu.memory_space<vmem>>, vector<36x288xbf16>
    %cst = arith.constant dense<0.000000e+00> : vector<8x288xf32>
    %29 = tpu.matmul %27, %28, %cst {dimension_numbers = #tpu.dot_dimension_numbers<[1], [0], [0], [1], [0, 0, 1, 1], [], []>} : vector<8x36xbf16>, vector<36x288xbf16>, vector<8x288xf32> -> vector<8x288xf32>
    %c0_51 = arith.constant 0 : index
    %c0_52 = arith.constant 0 : index
    %30 = vector.load %arg4[%c0_51, %c0_52] : memref<8x1xf32, #tpu.memory_space<vmem>>, vector<8x1xf32>
    %31 = vector.broadcast %30 : vector<8x1xf32> to vector<8x288xf32>
    %32 = arith.addf %29, %31 : vector<8x288xf32>
    %cst_53 = arith.constant 0.000000e+00 : f32
    %cst_54 = arith.constant 6.000000e+00 : f32
    %33 = vector.broadcast %cst_53 : f32 to vector<8x288xf32>
    %34 = arith.maximumf %33, %32 : vector<8x288xf32>
    %35 = vector.broadcast %cst_54 : f32 to vector<8x288xf32>
    %36 = arith.minimumf %35, %34 : vector<8x288xf32>
    %37 = arith.truncf %36 : vector<8x288xf32> to vector<8x288xbf16>
    %c0_55 = arith.constant 0 : index
    %c0_56 = arith.constant 0 : index
    %c0_57 = arith.constant 0 : index
    %c0_58 = arith.constant 0 : index
    %38 = vector.load %arg5[%c0_55, %c0_56, %c0_57, %c0_58] : memref<1x1x8x288xbf16, #tpu.memory_space<vmem>>, vector<1x1x8x288xbf16>
    %39 = vector.shape_cast %38 : vector<1x1x8x288xbf16> to vector<8x288xbf16>
    %40 = vector.shape_cast %37 : vector<8x288xbf16> to vector<1x1x8x288xbf16>
    tpu.vector_store %arg5[%c0_55, %c0_56, %c0_57, %c0_58], %40 {strides = array<i32>} : memref<1x1x8x288xbf16, #tpu.memory_space<vmem>>, vector<1x1x8x288xbf16>,
    return
  }
  func.func @transform_0(%arg0: i32, %arg1: i32) -> (i32, i32, i32, i32, i32) {
    %c0_i32 = arith.constant 0 : i32
    %c0_i32_0 = arith.constant 0 : i32
    %c0_i32_1 = arith.constant 0 : i32
    %c0_i32_2 = arith.constant 0 : i32
    return %arg0, %arg1, %c0_i32, %c0_i32_0, %c0_i32_1 : i32, i32, i32, i32, i32
  }
  func.func @transform_1(%arg0: i32, %arg1: i32) -> (i32, i32) {
    %c0_i32 = arith.constant 0 : i32
    %c0_i32_0 = arith.constant 0 : i32
    %c0_i32_1 = arith.constant 0 : i32
    return %c0_i32, %c0_i32_0 : i32, i32
  }
  func.func @transform_2(%arg0: i32, %arg1: i32) -> (i32, i32) {
    %c0_i32 = arith.constant 0 : i32
    %c0_i32_0 = arith.constant 0 : i32
    %c0_i32_1 = arith.constant 0 : i32
    return %c0_i32, %c0_i32_0 : i32, i32
  }
  func.func @transform_3(%arg0: i32, %arg1: i32) -> (i32, i32, i32, i32) {
    %c0_i32 = arith.constant 0 : i32
    %c0_i32_0 = arith.constant 0 : i32
    %c0_i32_1 = arith.constant 0 : i32
    return %arg0, %arg1, %c0_i32, %c0_i32_0 : i32, i32, i32, i32
  }
}

</mosaic_0001>

<bundles_post_ra>
// kernel: tpu_custom_call.1
= control target key start
LH: loop header
LB: loop body
LE: loop exit
PB: predicated region body
PF: predicated region fallthrough
CT: control target
= control target key end

     0   :  { %8 = vsyncpa [#allocation4], 0  ;;  %s1222_s0 = inlined_call_operand.hbm [shape: bf16[2,1,1,4,326], index: 0, kind: input, shape index: {}]   ;;  %s1223_s1 = inlined_call_operand.vmem [shape: bf16[8,36], index: 1, kind: input, shape index: {}]   ;;  %s1224_s2 = inlined_call_operand.vmem [shape: f32[8,1], index: 2, kind: input, shape index: {}]   ;;  %s1225_s3 = inlined_call_operand.hbm [shape: bf16[2,1,8,288], index: 3, kind: output, shape index: {}]  }
   0x1   :  { %10 = vsyncpa [#allocation4 + $0x1], 0 }
   0x2   :  { %11 = vsyncpa [#allocation5], 0 }
   0x3   :  { %13 = vsyncpa [#allocation5 + $0x1], 0  ;;  %s1029_s12 = smov 0   ;;  %s1031_s13 = smov 0  }
   0x4   :  { %s1033_s14 = smov 0   ;;  %s1035_s15 = smov 0  }
   0x5   :  { %s1037_s16 = smov 0   ;;  %s1039_s17 = smov 0  }
   0x6 LB: > { %s745_s18 = sadd.s32 4294967295, %s993_s17   ;;  %s746_s19 = sadd.s32 4294967294, %s993_s17   ;;  %s993_s17 = sphi %s1039_s17, %s19_s17   ;;  %s989_s16 = sphi %s1037_s16, %s1237_s16   ;;  %s985_s15 = sphi %s1035_s15, %s1236_s15   ;;  %s981_s14 = sphi %s1033_s14, %s1235_s14   ;;  %s977_s13 = sphi %s1031_s13, %s1234_s13   ;;  %s973_s12 = sphi %s1029_s12, %s1233_s12  }
   0x7   : > { %s31_s20 = sadd.s32 1, %s989_s16  ;;  %s40_s21 = sadd.s32 1, %s981_s14 }
   0x8   : > { %p33_p0 = scmp.ge.s32.totalorder %s31_s20, 2  ;;  %p47_p1 = scmp.ne.s32.totalorder %s981_s14, %s977_s13 }
   0x9   : > { %p48_p2 = scmp.eq.s32.totalorder %s993_s17, 0  ;;  %p53_p3 = scmp.ne.s32.totalorder %s977_s13, %s973_s12 }
   0xa   : > { %s1239_s20 = smov (%p33_p0, %s31_s20), 0  ;;  %p54_p5 = scmp.eq.s32.totalorder %s745_s18, 0 }
   0xb   : > { %p1070_p4 = por %p48_p2, %p47_p1  ;;  %s35_s23 = ssub.s32 %s989_s16, %s1239_s20 }
   0xc   : > { %p121_p6 = scmp.eq.s32.totalorder %s745_s18, 1  ;;  %p38_p7 = scmp.eq.s32.totalorder %s35_s23, 0 }
   0xd   : > { %p1076_p8 = por %p54_p5, %p53_p3  ;;  %p127_p10 = scmp.eq.s32.totalorder %s746_s19, 1 }
   0xe   : > { %p1080_p9 = por %p121_p6, %p47_p1  ;;  %p802_p13 = scmp.lt.s32.totalorder %s993_s17, 2 }
   0xf   : > { %s1085_s26 = scalar_select %p38_p7, %s981_s14, %s40_s21  }
  0x10   : > { %p1087_p11 = por %p127_p10, %p53_p3  ;;  %s153_s28 = sand.u32 1, %s981_s14  }
  0x11   : > { %s785_s29 = smul.u32 6, %s153_s28  ;;  %p1097_p0 = pnand %p802_p13, %p1070_p4 }
  0x12   : > { %s1229_s27 = scalar_select %p1087_p11, 1, 0 }
  0x13   : > { %s786_s30 = smul.u32 96, %s989_s16  ;;  %p750_p1 = scmp.ge.s32.totalorder %s993_s17, 1 }
  0x14   : > { %s157_s8 = scalar_lea.vmem [#allocation3], %s785_s29  ;;  %s154_s10 = scalar_lea.sflag [#allocation4], %s153_s28 }
  0x15   : > { %s165_s7 = scalar_lea.hbm %s1222_s0, %s786_s30  ;;  %s167_s9 = sshll.u32 %s157_s8, 4  ;;  %s168_s9 = int_to_ptr.vmem [resolvable:$true] %s167_s9 }
  0x16   : > { %p887_p2 = pneg %p1097_p0  ;;  %s898_s11 = scalar_lea.vmem %s168_s9, 96 }
  0x17   : > { %p899_p3 = scmp.ne.s32.totalorder %s168_s9, %s898_s11  ;;  %s995_s18 = smov [#allocation3]  }
  0x18   : > { %s903_s19 = sshll.u32 %s995_s18, 4  ;;  %s904_s19 = int_to_ptr.vmem [resolvable:$false] %s903_s19 }
  0x19   : > { %p901_p5 = pnand %p899_p3, %p887_p2  ;;  %s905_s21 = scalar_lea.vmem %s904_s19, 192 }
  0x1a   : > { %p906_p4 = scmp.lt.s32.totalorder %s168_s9, %s904_s19  ;;  %p907_p7 = scmp.lt.s32.totalorder %s905_s21, %s898_s11 }
  0x1b   : > { %p902_p6 = pneg %p901_p5 }
  0x1c   : > { %p908_p10 = por %p907_p7, %p906_p4 }
  0x1e   : > { %p909_p13 = pnand %p908_p10, %p902_p6 }
  0x20   : > { %912 = shalt.err (!%p909_p13)
}
  0x21   : > { %797 = dma.hbm_to_vmem [thread:$0]  (!%p1097_p0), %s165_s7, 96, %s168_s9, %s154_s10  }
  0x22   : > { %p172_p12 = scmp.lt.s32.totalorder %s993_s17, 3 }
  0x24   : > { %p173_p11 = pnand %p750_p1, %p172_p12 }
  0x25   : > { %s1113_s22 = sand.u32 (!%p173_p11), 1, %s977_s13  }
  0x26   : > { %176 = sbr.rel (%p173_p11) target bundleno = 428 (0x1ac), region = 32  ;;  %s179_s28 = scalar_lea.sflag (!%p173_p11), [#allocation4], %s1113_s22 }
  0x27   : > { %s787_s23 = smul.u32 (!%p173_p11), 6, %s1113_s22 }
  0x29   : > { %s1117_s29 = scalar_lea.vmem (!%p173_p11), [#allocation3], %s787_s23 }
  0x2b   : > { %964 = dma.done.wait (%p1076_p8), %s179_s28, 96  }
  0x2c   : > { %966 = vsyncadd (%p1076_p8), %s179_s28, 4294967200  ;;  %v219_v0 = vlaneseq  ;;  %v996_v1 = vmov 1983009808   ;;  %v440_v6 = vld [vmem:[%s1117_s29] sm:$0x3f]  ;;  %s997_s24 = smov 90  }
  0x2d   : > { %v217_v2 = vunpack.c.l.s4 %v996_v1  ;;  %v320_v7 = vld [vmem:[%s1117_s29] sm:$0x3f]  ;;  %v442_v12 = vcombine.high %v440_v6, %v440_v6  ;;  %s998_s30 = smov 109   ;;  %s999_s4 = smov 92   ;;  %vm226_vm0 = vcmask 254976   ;;  %v1001_v24 = vmov 0.0  }
  0x2e   : > { %v220_v3 = vshrl.u32 %v219_v0, 7  ;;  %v380_v8 = vld [vmem:[%s1117_s29] sm:$0x3f]  ;;  %v322_v14 = vcombine.high %v320_v7, %v320_v7  ;;  %s1000_s5 = smov 108   ;;  %775 = vmatprep.subr.bf16.mxu1 %v1001_v24  ;;  %s1002_s6 = smov 91   ;;  %vm1005_vm1 = vmmov 0  }
  0x2f   : > { %v218_v4 = vunpack.c.0.s8 %v217_v2  ;;  %v350_v11 = vld [vmem:[%s1117_s29] sm:$0x3f]  ;;  %v382_v21 = vcombine.high %v380_v8, %v380_v8  ;;  %s1003_s7 = smov 127   ;;  %s1004_s8 = smov 126   ;;  %781 = vmatprep.mubr.msk.bf16.mxu1 %vm1005_vm1, %v1001_v24  ;;  %v1007_v42 = vmov 0   ;;  %vm258_vm2 = vcmask 257026  }
  0x30   : > { %v206_v13 = vld [vmem:[%s1117_s29] sm:$0x3f]  ;;  %v352_v17 = vcombine.low %v350_v11, %v350_v11  ;;  %s1006_s9 = smov 110   ;;  %573 = vmatprep.mubr.bf16.mxu0 %v1007_v42  ;;  %864 = vset.pattern.permute.xlu0 %v1007_v42  ;;  %vm251_vm3 = vcmask 1043456   ;;  %vm464_vm4 = vcmask 736256   ;;  %vm344_vm5 = vcmask 891904  }
  0x31   : > { %v1123_v5 = vsub.s32 %v218_v4, %v220_v3  ;;  %751 = vst.sshfl [vmem:[#allocation2] sm:$0xf pattern:$0x76325410] %v206_v13  ;;  %v208_v18 = vcombine.high %v206_v13, %v206_v13  ;;  %v410_v22 = vld [vmem:[%s1117_s29] sm:$0x3f] }
  0x32   : > { %v412_v27 = vcombine.low %v410_v22, %v410_v22  ;;  %v228_v28 = vld [vmem:[%s1117_s29] sm:$0x3f]  ;;  %vm374_vm6 = vcmask 883712   ;;  %vm404_vm7 = vcmask 752640   ;;  %vm531_vm8 = vcmask 1041408   ;;  %s788_s21 = smul.u32 12, %s1113_s22 }
  0x33   : > { %v449_v9 = vrot.slane %v440_v6, %v1123_v5  ;;  %v329_v10 = vrot.slane %v320_v7, %v1123_v5  ;;  %v389_v15 = vrot.slane %v380_v8, %v1123_v5  ;;  %v366_v16 = vrot.slane %v350_v11, %v1123_v5  ;;  %v260_v32 = vld [vmem:[%s1117_s29] sm:$0x3f]  ;;  %s789_s28 = smul.u32 192, %s985_s15 }
  0x34   : > { %v456_v19 = vrot.slane %v442_v12, %v1123_v5  ;;  %v336_v20 = vrot.slane %v322_v14, %v1123_v5  ;;  %v222_v23 = vrot.slane %v208_v18, %v1123_v5  ;;  %v359_v25 = vrot.slane %v352_v17, %v1123_v5  ;;  %v290_v36 = vld [vmem:[%s1117_s29] sm:$0x3f]  ;;  %s204_s23 = scalar_lea.vmem [#allocation6], %s788_s21 }
  0x35   : > { %457 = vrot.lane.b32.xlu0 %v449_v9, %s997_s24  ;;  %337 = vrot.lane.b32.xlu1 %v329_v10, %s998_s30  ;;  %v396_v26 = vrot.slane %v382_v21, %v1123_v5  ;;  %v419_v29 = vrot.slane %v412_v27, %v1123_v5  ;;  %v426_v30 = vrot.slane %v410_v22, %v1123_v5  ;;  %v481_v43 = vld [vmem:[%s1224_s2] sm:$0xff]  ;;  %vm434_vm9 = vcmask 744448   ;;  %s661_s29 = sshll.u32 %s204_s23, 4  ;;  %s662_s29 = int_to_ptr.vmem [resolvable:$true] %s661_s29 }
  0x36   : > { %227 = vst.msk [vmem:[#allocation2 + $0x8] sm:$0x3] %vm226_vm0, %v222_v23  ;;  %v230_v31 = vcombine.low %v228_v28, %v228_v28  ;;  %v244_v33 = vrot.slane %v228_v28, %v1123_v5  ;;  %v262_v35 = vcombine.high %v260_v32, %v260_v32  ;;  %v269_v38 = vrot.slane %v260_v32, %v1123_v5 }
  0x37   : > { %v292_v39 = vcombine.low %v290_v36, %v290_v36  ;;  %v306_v40 = vrot.slane %v290_v36, %v1123_v5  ;;  %vm253_vm10 = vcmask 1039360   ;;  %vm284_vm11 = vcmask 1031168  }
  0x38   : > { %v237_v34 = vrot.slane %v230_v31, %v1123_v5  ;;  %v276_v37 = vrot.slane %v262_v35, %v1123_v5  ;;  %vm314_vm12 = vcmask 900096   ;;  %vm527_vm13 = vcmask 293888  }
  0x39   : > { %397 = vrot.lane.b32.xlu0 %v389_v15, %s999_s4  ;;  %369 = vrot.lane.b32.xlu1 %v366_v16, %s1000_s5  ;;  %v299_v41 = vrot.slane %v292_v39, %v1123_v5  ;;  %vm642_vm14 = vcmask 257024  }
  0x3d   : > { %459 = vrot.lane.b32.xlu0 %v456_v19, %s997_s24  ;;  %339 = vrot.lane.b32.xlu1 %v336_v20, %s998_s30 }
  0x41   : > { %367 = vrot.lane.b32.xlu0 %v359_v25, %s1000_s5  ;;  %399 = vrot.lane.b32.xlu1 %v396_v26, %s999_s4  ;;  %s659_s4 = scalar_lea.hbm %s1225_s3, %s789_s28  ;;  %s645_s5 = scalar_lea.sflag [#allocation5], %s1113_s22 }
  0x45   : > { %427 = vrot.lane.b32.xlu0 %v419_v29, %s1002_s6  ;;  %429 = vrot.lane.b32.xlu1 %v426_v30, %s1002_s6  ;;  %s913_s6 = scalar_lea.vmem %s662_s29, 192 }
  0x46   : > { %p914_p8 = scmp.ne.s32.totalorder %s662_s29, %s913_s6 }
  0x48   : > { %p915_p11 = pnand %p914_p8, %p1080_p9 }
  0x49   : > { %247 = vrot.lane.b32.xlu1 %v244_v33, %s1003_s7  ;;  %245 = vrot.lane.b32.xlu0 %v237_v34, %s1003_s7  ;;  %s1008_s7 = smov [#allocation6]  }
  0x4a   : > { %p916_p12 = pneg %p915_p11 }
  0x4d   : > { %279 = vrot.lane.b32.xlu1 %v276_v37, %s1004_s8  ;;  %277 = vrot.lane.b32.xlu0 %v269_v38, %s1004_s8  ;;  %s917_s8 = sshll.u32 %s1008_s7, 4  ;;  %s918_s8 = int_to_ptr.vmem [resolvable:$false] %s917_s8 }
  0x4e   : > { %s919_s15 = scalar_lea.vmem %s918_s8, 384  ;;  %p920_p0 = scmp.lt.s32.totalorder %s662_s29, %s918_s8 }
  0x4f   : > { %p921_p1 = scmp.lt.s32.totalorder %s919_s15, %s913_s6 }
  0x51   : > { %309 = vrot.lane.b32.xlu1 %v306_v40, %s1006_s9  ;;  %307 = vrot.lane.b32.xlu0 %v299_v41, %s1006_s9  ;;  %p922_p2 = por %p921_p1, %p920_p0 }
  0x53   : > { %p923_p3 = pnand %p922_p2, %p916_p12 }
  0x55   : > { %484 = vperm.xlu0 %864, %v481_v43  }
  0xa7   : > { %v458_v44 = vpop.permute.xlu0 %457  ;;  %v338_v45 = vpop.permute.xlu1 %337 }
  0xa8   : > { %v461_v50 = vrot.slane %v458_v44, 4  ;;  %v341_v51 = vrot.slane %v338_v45, 4 }
  0xab   : > { %v398_v46 = vpop.permute.xlu0 %397  ;;  %v370_v47 = vpop.permute.xlu1 %369 }
  0xac   : > { %379 = vst.msk [vmem:[#allocation2 + $0x20] sm:$0xc] %vm258_vm2, %v370_v47  ;;  %v401_v60 = vrot.slane %v398_v46, 4  ;;  %v372_v61 = vrot.slane %v370_v47, 4 }
  0xaf   : > { %v460_v48 = vpop.permute.xlu0 %459  ;;  %v340_v49 = vpop.permute.xlu1 %339 }
  0xb0   : > { %v462_v52 = vrot.slane %v460_v48, 4  ;;  %469 = vst.msk [vmem:[#allocation2 + $0x38] sm:$0x3] %vm226_vm0, %v460_v48  ;;  %v342_v53 = vrot.slane %v340_v49, 4  ;;  %349 = vst.msk [vmem:[#allocation2 + $0x20] sm:$0x3] %vm226_vm0, %v340_v49 }
  0xb2   : > { %v463_v54 = vsel %vm251_vm3, %v461_v50, %v462_v52  ;;  %v343_v55 = vsel %vm251_vm3, %v341_v51, %v342_v53 }
  0xb3   : > { %v465_v56 = vsel %vm464_vm4, %v458_v44, %v463_v54  ;;  %v345_v57 = vsel %vm344_vm5, %v338_v45, %v343_v55  ;;  %v368_v58 = vpop.permute.xlu0 %367  ;;  %v400_v59 = vpop.permute.xlu1 %399 }
  0xb4   : > { %468 = vst [vmem:[#allocation2 + $0x30] sm:$0x33] %v465_v56  ;;  %348 = vst [vmem:[#allocation2 + $0x18] sm:$0x33] %v345_v57  ;;  %v371_v62 = vrot.slane %v368_v58, 4  ;;  %v402_v63 = vrot.slane %v400_v59, 4 }
  0xb5   : > { %409 = vst.msk [vmem:[#allocation2 + $0x2c] sm:$0x3] %vm226_vm0, %v400_v59 }
  0xb6   : > { %v373_v0 = vsel %vm251_vm3, %v371_v62, %v372_v61  ;;  %v403_v1 = vsel %vm251_vm3, %v401_v60, %v402_v63 }
  0xb7   : > { %v375_v2 = vsel %vm374_vm6, %v368_v58, %v373_v0  ;;  %v405_v3 = vsel %vm404_vm7, %v398_v46, %v403_v1  ;;  %v428_v4 = vpop.permute.xlu0 %427  ;;  %v430_v5 = vpop.permute.xlu1 %429  ;;  %v874_v6 = vld [vmem:[#allocation2 + $0x38] ss:$0 sps:$4 sm:$0x33]  }
  0xb8   : > { %378 = vst [vmem:[#allocation2 + $0x18] sm:$0xcc] %v375_v2  ;;  %408 = vst [vmem:[#allocation2 + $0x24] sm:$0x33] %v405_v3  ;;  %v431_v7 = vrot.slane %v428_v4, 4  ;;  %v432_v8 = vrot.slane %v430_v5, 4 }
  0xb9   : > { %439 = vst.msk [vmem:[#allocation2 + $0x2c] sm:$0xc] %vm258_vm2, %v430_v5  ;;  %v539_v9 = vsel %vm531_vm8, %v874_v6, 0 }
  0xba   : > { %v433_v10 = vsel %vm251_vm3, %v431_v7, %v432_v8  ;;  %776 = vmatpush3.bf16.msra.mxu1 %v539_v9 }
  0xbb   : > { %v435_v11 = vsel %vm434_vm9, %v428_v4, %v433_v10  ;;  %v248_v12 = vpop.permute.xlu1 %247  ;;  %v246_v13 = vpop.permute.xlu0 %245  ;;  %v479_v14 = vld [vmem:[#allocation2 + $0x30] sm:$0x33]  ;;  %777 = vmatprep.subr.bf16.mxu1 %v1001_v24 }
  0xbc   : > { %438 = vst [vmem:[#allocation2 + $0x24] sm:$0xcc] %v435_v11  ;;  %v250_v15 = vrot.slane %v248_v12, 4  ;;  %259 = vst.msk [vmem:[#allocation2 + $0x8] sm:$0xc] %vm258_vm2, %v248_v12  ;;  %v249_v16 = vrot.slane %v246_v13, 4  ;;  %v759_v17 = vcombine.high %v479_v14, %v479_v14  ;;  %v758_v18 = vcombine.low %v479_v14, %v479_v14 }
  0xbe   : > { %v252_v19 = vsel %vm251_vm3, %v249_v16, %v250_v15  ;;  %761 = vmatprep.subr.msk.bf16.mxu0 %vm531_vm8, %v759_v17  ;;  %v533_v20 = vsel %vm531_vm8, %v758_v18, 0 }
  0xbf   : > { %v254_v21 = vsel %vm253_vm10, %v246_v13, %v252_v19  ;;  %552 = vmatpush1.bf16.msra.mxu0 %v533_v20  ;;  %v280_v22 = vpop.permute.xlu1 %279  ;;  %v278_v23 = vpop.permute.xlu0 %277 }
  0xc0   : > { %v877_v25 = vld [vmem:[#allocation2 + $0x20] ss:$12 sps:$4 sm:$0xff]   ;;  %257 = vst [vmem:[#allocation2] sm:$0xcc] %v254_v21  ;;  %v282_v26 = vrot.slane %v280_v22, 4  ;;  %v281_v27 = vrot.slane %v278_v23, 4 }
  0xc1   : > { %289 = vst.msk [vmem:[#allocation2 + $0x14] sm:$0x3] %vm226_vm0, %v280_v22  ;;  %778 = vmatpush3.bf16.msra.mxu1 %v877_v25 }
  0xc2   : > { %v283_v28 = vsel %vm251_vm3, %v281_v27, %v282_v26  ;;  %779 = vmatprep.subr.bf16.mxu1 %v1001_v24  ;;  %v470_v24 = vld [vmem:[%s1223_s1] sm:$0xf] }
  0xc3   : > { %v285_v29 = vsel %vm284_vm11, %v278_v23, %v283_v28  ;;  %v310_v30 = vpop.permute.xlu1 %309  ;;  %v308_v31 = vpop.permute.xlu0 %307  ;;  %v878_v32 = vld [vmem:[#allocation2 + $0x1c] ss:$12 sps:$4 sm:$0xff]   ;;  %v880_v33 = vld [vmem:[#allocation2 + $0x18] ss:$12 sps:$4 sm:$0xff]  }
  0xc4   : > { %288 = vst [vmem:[#allocation2 + $0xc] sm:$0x33] %v285_v29  ;;  %v312_v34 = vrot.slane %v310_v30, 4  ;;  %319 = vst.msk [vmem:[#allocation2 + $0x14] sm:$0xc] %vm258_vm2, %v310_v30  ;;  %v311_v35 = vrot.slane %v308_v31, 4  ;;  %553 = vmatprep.subr.bf16.mxu0 %v878_v32 }
  0xc5   : > { %554 = vmatpush1.bf16.msra.mxu0 %v880_v33 }
  0xc6   : > { %v313_v36 = vsel %vm251_vm3, %v311_v35, %v312_v34 }
  0xc7   : > { %v315_v37 = vsel %vm314_vm12, %v308_v31, %v313_v36 }
  0xc8   : > { %318 = vst [vmem:[#allocation2 + $0xc] sm:$0xcc] %v315_v37 }
  0xcb   : > { %v881_v38 = vld [vmem:[#allocation2 + $0x8] ss:$12 sps:$4 sm:$0xff]  }
  0xcc   : > { %780 = vmatpush3.bf16.msra.mxu1 %v881_v38 }
  0xcf   : > { %v882_v39 = vld [vmem:[#allocation2 + $0x4] ss:$12 sps:$4 sm:$0xff]   ;;  %v884_v40 = vld [vmem:[#allocation2] ss:$12 sps:$4 sm:$0xff]   ;;  %782 = vmatmul.mubr.msk.bf16.vlgmr.msra.gmra.mxu1 %vm527_vm13, %v470_v24 }
  0xd0   : > { %555 = vmatprep.subr.bf16.mxu0 %v882_v39  ;;  %v485_v42 = vpop.permute.xlu0 %484 }
  0xd1   : > { %556 = vmatpush1.bf16.msra.mxu0 %v884_v40 }
  0xd4   : > { %762 = vmatmul.mubr.msk.bf16.vlgmr.msra.gmra.mxu0 %vm527_vm13, %v470_v24 }
 0x18f   : > { %v616_v41 = vpop.f32.mrf.mxu1 }
 0x190   : > { %v617_v43 = vadd.f32 %v616_v41, %v485_v42 }
 0x191   : > { %v783_v44 = vpop.f32.mrf.mxu1 }
 0x192   : > { %v624_v45 = vmax.f32 %v617_v43, 0.0 }
 0x193   : > { %v619_v46 = vpop.f32.mrf.mxu1 }
 0x194   : > { %v627_v47 = vmin.f32 %v624_v45, 6.0  ;;  %v575_v48 = vpop.f32.mrf.mxu0 }
 0x195   : > { %v576_v49 = vadd.f32 %v575_v48, %v485_v42  ;;  %v784_v50 = vpop.f32.mrf.mxu1 }
 0x196   : > { %v770_v51 = vpack.c.bf16 %v627_v47, %v627_v47  ;;  %v577_v52 = vpop.f32.mrf.mxu0 }
 0x197   : > { %v622_v53 = vmax.f32 %v576_v49, 0.0  ;;  %v578_v54 = vadd.f32 %v577_v52, %v485_v42 }
 0x198   : > { %v579_v55 = vpop.f32.mrf.mxu0  ;;  %643 = vst.msk [vmem:[%s204_s23 + $0x8] sm:$0xf] %vm642_vm14, %v770_v51 }
 0x199   : > { %v623_v56 = vmax.f32 %v578_v54, 0.0  ;;  %v625_v58 = vmin.f32 %v622_v53, 6.0 }
 0x19a   : > { %v580_v57 = vpop.f32.mrf.mxu0 }
 0x19b   : > { %v626_v59 = vmin.f32 %v623_v56, 6.0 }
 0x19d   : > { %v769_v60 = vpack.c.bf16 %v626_v59, %v625_v58 }
 0x19f   : > { %641 = vst [vmem:[%s204_s23] sm:$0xff] %v769_v60 }
 0x1a0   : > { %926 = shalt.err (!%p923_p3)
}
 0x1a1   : > { %s927_s9 = scalar_lea.hbm %s659_s4, 192  ;;  %s931_s11 = scalar_lea.hbm %s1225_s3, 384 }
 0x1a2   : > { %p928_p5 = scmp.ne.s32.totalorder %s659_s4, %s927_s9  ;;  %p932_p7 = scmp.lt.s32.totalorder %s659_s4, %s1225_s3 }
 0x1a3   : > { %p933_p10 = scmp.lt.s32.totalorder %s931_s11, %s927_s9 }
 0x1a4   : > { %p929_p6 = pnand %p928_p5, %p1080_p9 }
 0x1a5   : > { %p934_p13 = por %p933_p10, %p932_p7 }
 0x1a6   : > { %p930_p4 = pneg %p929_p6 }
 0x1a8   : > { %p935_p8 = pnand %p934_p13, %p930_p4 }
 0x1aa   : > { %938 = shalt.err (!%p935_p8)
}
 0x1ab   : > { %792 = dma.vmem_to_hbm [thread:$0]  (%p1080_p9), %s662_s29, 192, %s659_s4, %s645_s5  }
 0x1ac PF: > { %s673_s21 = sand.u32 1, %s973_s12   ;;  %p1231_p11 = scmp.ne.s32.totalorder %s1229_s27, 0 }
 0x1ad   : > { %p1232_p12 = scmp.ge.s32.totalorder %s993_s17, 2  ;;  %s674_s23 = scalar_lea.sflag [#allocation5], %s673_s21 }
 0x1af   : > { %p799_p0 = pnand %p1232_p12, %p1231_p11 }
 0x1b1   : > { %p800_p1 = pneg %p799_p0 }
 0x1b3   : > { %968 = dma.done.wait (%p800_p1), %s674_s23, 192  }
 0x1b4   : > { %970 = vsyncadd (%p800_p1), %s674_s23, 4294967104  ;;  %s19_s17 = sadd.s32 1, %s993_s17   ;;  %s1233_s12 = smov %s977_s13 }
 0x1b5   : > { %p16_p2 = scmp.ge.s32.totalorder %s19_s17, 4   ;;  %s1234_s13 = smov %s981_s14 }
 0x1b6   : > { %s1235_s14 = smov %s1085_s26  ;;  %s1236_s15 = smov %s989_s16 }
 0x1b7   : > { %s1237_s16 = smov %s1239_s20  ;;  %18 = sbr.rel (!%p16_p2) target bundleno = 6 (0x6), region = 77 }
 0x1bc   :  { %679 = vsyncpa [#allocation4], 1 }
 0x1bd   :  { %681 = vsyncpa [#allocation4 + $0x1], 1 }
 0x1be   :  { %682 = vsyncpa [#allocation5], 1 }
 0x1bf   :  { %684 = vsyncpa [#allocation5 + $0x1], 1 }

</bundles_post_ra>
